<compile_context>
chip_gen: v5e
topology: v5e:2x2
jax: 0.10.0
libtpu: 0.0.40
codegen_flags: <defaults>
</compile_context>

<pallas_src>
import jax
import jax.numpy as jnp
from jax.experimental import pallas as pl
from jax.experimental.pallas import tpu as pltpu

H1, H2, H3, H_OUT = 128, 32, 64, 1


def _critic_kernel(s_ref, a_ref,
                   w1_ref, b1_ref,
                   w2_ref, b2_ref,
                   w3h_ref, w3a_ref, b3_ref,
                   w4_ref, b4_ref,
                   o_ref):
    cdt = w1_ref.dtype            # MXU operand dtype (fp32 or bf16)
    f32 = jnp.float32

    s = s_ref[...].astype(cdt)
    a = a_ref[...].astype(cdt)

    # layer 1: state_dim -> 128 (MXU, fp32 accumulation)
    h1 = jnp.dot(s, w1_ref[...], preferred_element_type=f32) + b1_ref[...]
    h1 = jnp.maximum(h1, 0.0).astype(cdt)

    # layer 2: 128 -> 32
    h2 = jnp.dot(h1, w2_ref[...], preferred_element_type=f32) + b2_ref[...]
    h2 = jnp.maximum(h2, 0.0).astype(cdt)

    # layer 3 on cat([h2, a]):  cat([h2, a]) @ W3 == h2 @ W3[:32] + a @ W3[32:]
    h3 = (jnp.dot(h2, w3h_ref[...], preferred_element_type=f32)
          + jnp.dot(a, w3a_ref[...], preferred_element_type=f32)
          + b3_ref[...])
    h3 = jnp.maximum(h3, 0.0)                     # keep fp32, no MXU after this

    # layer 4: 64 -> 1, done on the VPU/XLU instead of an N=1 MXU matmul.
    # w4_ref is the weight as a (1, 64) row; lane reduce gives (tb, 1).
    h4 = jnp.sum(h3 * w4_ref[...].astype(f32), axis=-1, keepdims=True) + b4_ref[...]
    o_ref[...] = jnp.maximum(h4, 0.0).astype(o_ref.dtype)


def _detect_num_tensorcores():
    """Best-effort TensorCore-per-chip count (v7x has 2; v5e/v6e have 1)."""
    try:
        dev = jax.devices()[0]
        if dev.platform != "tpu":
            return 1
        nc = getattr(dev, "num_cores", None)
        if isinstance(nc, int) and nc > 0:
            return nc
        kind = (getattr(dev, "device_kind", "") or "").lower()
        if "v7" in kind:
            return 2
    except Exception:
        pass
    return 1


def _pick_batch_tile(B, max_batch_tile, num_cores):
    """Largest sublane-aligned batch tile; >= num_cores blocks on multi-TC chips."""
    if num_cores >= 2 and B >= 16:
        # Split into (at least) num_cores parallel blocks so megacore sharding
        # can use both TensorCores.
        target = pl.cdiv(B, num_cores)
        target = ((target + 7) // 8) * 8            # round UP to sublane
        tb = min(max_batch_tile, target)
    else:
        # 1-TC chips: biggest single tile (grid steps are pure overhead here).
        tb = min(B, max_batch_tile)
    if tb < B:
        tb = max(8, tb - (tb % 8))                  # sublane-align partial tiles
    return tb


def critic_forward(s, a, params, *, max_batch_tile=2048):
    """Pallas forward pass for CriticNet.

    s: (B, state_dim) fp32 or bf16
    a: (B, action_dim) fp32 or bf16
    params: dict with w1,b1,w2,b2,w3h,w3a,b3,w4,b4
            (weights as (in, out) in fp32 or bf16, biases as (1, out) fp32)
    """
    B, state_dim = s.shape
    _, action_dim = a.shape

    num_cores = _detect_num_tensorcores()
    tb = _pick_batch_tile(B, max_batch_tile, num_cores)
    n_blocks = pl.cdiv(B, tb)

    # layer-4 weight as a (1, 64) row for the VPU reduce
    w4_row = params["w4"].reshape(1, H3)

    def batch_spec(feat):
        return pl.BlockSpec((tb, feat), lambda i: (i, 0))

    def resident_spec(arr):
        # Constant index map -> block stays VMEM-resident across grid steps.
        return pl.BlockSpec(arr.shape, lambda i: (0, 0))

    operands = (
        s, a,
        params["w1"], params["b1"],
        params["w2"], params["b2"],
        params["w3h"], params["w3a"], params["b3"],
        w4_row, params["b4"],
    )
    in_specs = [batch_spec(state_dim), batch_spec(action_dim)]
    in_specs += [resident_spec(op) for op in operands[2:]]

    flops = 2 * B * (state_dim * H1 + H1 * H2 + H2 * H3 + action_dim * H3 + H3 * H_OUT)
    bytes_accessed = sum(int(op.size) * op.dtype.itemsize for op in operands)
    bytes_accessed += B * H_OUT * 4
    cost = pl.CostEstimate(flops=flops, transcendentals=0,
                           bytes_accessed=bytes_accessed)

    return pl.pallas_call(
        _critic_kernel,
        out_shape=jax.ShapeDtypeStruct((B, H_OUT), jnp.float32),
        grid=(n_blocks,),
        in_specs=in_specs,
        out_specs=pl.BlockSpec((tb, H_OUT), lambda i: (i, 0)),
        compiler_params=pltpu.CompilerParams(
            dimension_semantics=("parallel",),          # megacore on 2-TC chips
            vmem_limit_bytes=32 * 1024 * 1024,          # past v5e's 16 MiB default
        ),
        cost_estimate=cost,
    )(*operands)


def init_critic_params(key, state_dim, action_dim, dtype=jnp.bfloat16):
    """Mimics PyTorch nn.Linear default init (uniform +-1/sqrt(fan_in)).

    linear3's weight is generated as a single (32+action_dim, 64) matrix and
    split row-wise into w3h / w3a so the no-concat kernel matches the module
    exactly. Biases are always fp32; weights are stored in `dtype`
    (default bf16 — MXU-native on all current TPU generations).
    """
    ks = jax.random.split(key, 8)

    def linear(kw, kb, fan_in, fan_out):
        bound = 1.0 / jnp.sqrt(jnp.float32(fan_in))
        w = jax.random.uniform(kw, (fan_in, fan_out), jnp.float32, -bound, bound)
        b = jax.random.uniform(kb, (1, fan_out), jnp.float32, -bound, bound)
        return w, b

    w1, b1 = linear(ks[0], ks[1], state_dim, H1)
    w2, b2 = linear(ks[2], ks[3], H1, H2)
    w3, b3 = linear(ks[4], ks[5], H2 + action_dim, H3)
    w4, b4 = linear(ks[6], ks[7], H3, H_OUT)

    params = {
        "w1": w1, "b1": b1,
        "w2": w2, "b2": b2,
        "w3h": w3[:H2, :], "w3a": w3[H2:, :], "b3": b3,
        "w4": w4, "b4": b4,
    }
    return {k: (v.astype(dtype) if k.startswith("w") else v)
            for k, v in params.items()}


def critic_forward_ref(s, a, params):
    """Pure-JAX fp32 reference for correctness checking."""
    f32 = lambda t: t.astype(jnp.float32)
    h1 = jnp.maximum(f32(s) @ f32(params["w1"]) + params["b1"], 0.0)
    h2 = jnp.maximum(h1 @ f32(params["w2"]) + params["b2"], 0.0)
    x = jnp.concatenate([h2, f32(a)], axis=1)
    w3 = jnp.concatenate([f32(params["w3h"]), f32(params["w3a"])], axis=0)
    h3 = jnp.maximum(x @ w3 + params["b3"], 0.0)
    return jnp.maximum(h3 @ f32(params["w4"]) + params["b4"], 0.0)


if __name__ == "__main__":
    batch = 8
    state_dim = 24
    action_dim = 8

    key = jax.random.PRNGKey(0)
    ks, ka, kp = jax.random.split(key, 3)
    s = jax.random.normal(ks, (batch, state_dim), jnp.float32)
    a = jax.random.normal(ka, (batch, action_dim), jnp.float32)

    # --- fp32 path: bitwise-faithful, tight tolerance -----------------------
    params_f32 = init_critic_params(kp, state_dim, action_dim, dtype=jnp.float32)
    ref = critic_forward_ref(s, a, params_f32)

    out_f32 = jax.block_until_ready(critic_forward(s, a, params_f32))
    assert out_f32.shape == (batch, 1)
    assert jnp.allclose(out_f32, ref, atol=1e-5, rtol=1e-5), "fp32 mismatch vs reference"

    # --- bf16 path: bf16 weights AND bf16 activations (fp32 accumulation) ---
    params_bf16 = {k: (v.astype(jnp.bfloat16) if k.startswith("w") else v)
                   for k, v in params_f32.items()}
    s_bf16 = s.astype(jnp.bfloat16)
    a_bf16 = a.astype(jnp.bfloat16)
    out_bf16 = jax.block_until_ready(critic_forward(s_bf16, a_bf16, params_bf16))
    assert out_bf16.shape == (batch, 1)
    assert jnp.allclose(out_bf16, ref, atol=7e-2, rtol=7e-2), "bf16 mismatch vs reference"

    # --- multi-block tiling path (partial last tile), fp32 ------------------
    big_batch = 40
    ks2, ka2 = jax.random.split(jax.random.PRNGKey(1), 2)
    s_big = jax.random.normal(ks2, (big_batch, state_dim), jnp.float32)
    a_big = jax.random.normal(ka2, (big_batch, action_dim), jnp.float32)
    ref_big = critic_forward_ref(s_big, a_big, params_f32)
    out_big = jax.block_until_ready(
        critic_forward(s_big, a_big, params_f32, max_batch_tile=16))
    assert out_big.shape == (big_batch, 1)
    assert jnp.allclose(out_big, ref_big, atol=1e-5, rtol=1e-5), "tiled mismatch vs reference"

    print("KERNEL_OK")
</pallas_src>

<mosaic_0001>
module attributes {stable_mosaic.version = 11 : i64} {
  func.func @_critic_kernel(%arg0: i32, %arg1: memref<8x24xf32, #tpu.memory_space<vmem>>, %arg2: memref<8x8xf32, #tpu.memory_space<vmem>>, %arg3: memref<24x128xf32, #tpu.memory_space<vmem>>, %arg4: memref<1x128xf32, #tpu.memory_space<vmem>>, %arg5: memref<128x32xf32, #tpu.memory_space<vmem>>, %arg6: memref<1x32xf32, #tpu.memory_space<vmem>>, %arg7: memref<32x64xf32, #tpu.memory_space<vmem>>, %arg8: memref<8x64xf32, #tpu.memory_space<vmem>>, %arg9: memref<1x64xf32, #tpu.memory_space<vmem>>, %arg10: memref<1x64xf32, #tpu.memory_space<vmem>>, %arg11: memref<1x1xf32, #tpu.memory_space<vmem>>, %arg12: memref<8x1xf32, #tpu.memory_space<vmem>>) attributes {dimension_semantics = [#tpu.dimension_semantics<parallel>], iteration_bounds = array<i64: 1>, scalar_prefetch = 0 : i64, scratch_operands = 0 : i64, tpu.core_type = #tpu.core_type<tc>, window_params = [{transform_indices = @transform_0, window_bounds = array<i64: 8, 24>}, {transform_indices = @transform_1, window_bounds = array<i64: 8, 8>}, {pipeline_mode = #tpu.pipeline_mode<synchronous>, transform_indices = @transform_2, window_bounds = array<i64: 24, 128>}, {pipeline_mode = #tpu.pipeline_mode<synchronous>, transform_indices = @transform_3, window_bounds = array<i64: 1, 128>}, {pipeline_mode = #tpu.pipeline_mode<synchronous>, transform_indices = @transform_4, window_bounds = array<i64: 128, 32>}, {pipeline_mode = #tpu.pipeline_mode<synchronous>, transform_indices = @transform_5, window_bounds = array<i64: 1, 32>}, {pipeline_mode = #tpu.pipeline_mode<synchronous>, transform_indices = @transform_6, window_bounds = array<i64: 32, 64>}, {pipeline_mode = #tpu.pipeline_mode<synchronous>, transform_indices = @transform_7, window_bounds = array<i64: 8, 64>}, {pipeline_mode = #tpu.pipeline_mode<synchronous>, transform_indices = @transform_8, window_bounds = array<i64: 1, 64>}, {pipeline_mode = #tpu.pipeline_mode<synchronous>, transform_indices = @transform_9, window_bounds = array<i64: 1, 64>}, {pipeline_mode = #tpu.pipeline_mode<synchronous>, transform_indices = @transform_10, window_bounds = array<i64: 1, 1>}, {transform_indices = @transform_11, window_bounds = array<i64: 8, 1>}]} {
    %c0 = arith.constant 0 : index
    %c0_0 = arith.constant 0 : index
    %0 = vector.load %arg1[%c0, %c0_0] : memref<8x24xf32, #tpu.memory_space<vmem>>, vector<8x24xf32>
    %c0_1 = arith.constant 0 : index
    %c0_2 = arith.constant 0 : index
    %1 = vector.load %arg2[%c0_1, %c0_2] : memref<8x8xf32, #tpu.memory_space<vmem>>, vector<8x8xf32>
    %c0_3 = arith.constant 0 : index
    %c0_4 = arith.constant 0 : index
    %2 = vector.load %arg3[%c0_3, %c0_4] : memref<24x128xf32, #tpu.memory_space<vmem>>, vector<24x128xf32>
    %cst = arith.constant dense<0.000000e+00> : vector<8x128xf32>
    %3 = tpu.matmul %0, %2, %cst {dimension_numbers = #tpu.dot_dimension_numbers<[1], [0], [0], [1], [0, 0, 1, 1], [], []>} : vector<8x24xf32>, vector<24x128xf32>, vector<8x128xf32> -> vector<8x128xf32>
    %c0_5 = arith.constant 0 : index
    %c0_6 = arith.constant 0 : index
    %4 = vector.load %arg4[%c0_5, %c0_6] : memref<1x128xf32, #tpu.memory_space<vmem>>, vector<1x128xf32>
    %5 = vector.broadcast %4 : vector<1x128xf32> to vector<8x128xf32>
    %6 = arith.addf %3, %5 : vector<8x128xf32>
    %cst_7 = arith.constant 0.000000e+00 : f32
    %7 = vector.broadcast %cst_7 : f32 to vector<8x128xf32>
    %8 = arith.maximumf %6, %7 : vector<8x128xf32>
    %c0_8 = arith.constant 0 : index
    %c0_9 = arith.constant 0 : index
    %9 = vector.load %arg5[%c0_8, %c0_9] : memref<128x32xf32, #tpu.memory_space<vmem>>, vector<128x32xf32>
    %cst_10 = arith.constant dense<0.000000e+00> : vector<8x32xf32>
    %10 = tpu.matmul %8, %9, %cst_10 {dimension_numbers = #tpu.dot_dimension_numbers<[1], [0], [0], [1], [0, 0, 1, 1], [], []>} : vector<8x128xf32>, vector<128x32xf32>, vector<8x32xf32> -> vector<8x32xf32>
    %c0_11 = arith.constant 0 : index
    %c0_12 = arith.constant 0 : index
    %11 = vector.load %arg6[%c0_11, %c0_12] : memref<1x32xf32, #tpu.memory_space<vmem>>, vector<1x32xf32>
    %12 = vector.broadcast %11 : vector<1x32xf32> to vector<8x32xf32>
    %13 = arith.addf %10, %12 : vector<8x32xf32>
    %cst_13 = arith.constant 0.000000e+00 : f32
    %14 = vector.broadcast %cst_13 : f32 to vector<8x32xf32>
    %15 = arith.maximumf %13, %14 : vector<8x32xf32>
    %c0_14 = arith.constant 0 : index
    %c0_15 = arith.constant 0 : index
    %16 = vector.load %arg7[%c0_14, %c0_15] : memref<32x64xf32, #tpu.memory_space<vmem>>, vector<32x64xf32>
    %cst_16 = arith.constant dense<0.000000e+00> : vector<8x64xf32>
    %17 = tpu.matmul %15, %16, %cst_16 {dimension_numbers = #tpu.dot_dimension_numbers<[1], [0], [0], [1], [0, 0, 1, 1], [], []>} : vector<8x32xf32>, vector<32x64xf32>, vector<8x64xf32> -> vector<8x64xf32>
    %c0_17 = arith.constant 0 : index
    %c0_18 = arith.constant 0 : index
    %18 = vector.load %arg8[%c0_17, %c0_18] : memref<8x64xf32, #tpu.memory_space<vmem>>, vector<8x64xf32>
    %cst_19 = arith.constant dense<0.000000e+00> : vector<8x64xf32>
    %19 = tpu.matmul %1, %18, %cst_19 {dimension_numbers = #tpu.dot_dimension_numbers<[1], [0], [0], [1], [0, 0, 1, 1], [], []>} : vector<8x8xf32>, vector<8x64xf32>, vector<8x64xf32> -> vector<8x64xf32>
    %20 = arith.addf %17, %19 : vector<8x64xf32>
    %c0_20 = arith.constant 0 : index
    %c0_21 = arith.constant 0 : index
    %21 = vector.load %arg9[%c0_20, %c0_21] : memref<1x64xf32, #tpu.memory_space<vmem>>, vector<1x64xf32>
    %22 = vector.broadcast %21 : vector<1x64xf32> to vector<8x64xf32>
    %23 = arith.addf %20, %22 : vector<8x64xf32>
    %cst_22 = arith.constant 0.000000e+00 : f32
    %24 = vector.broadcast %cst_22 : f32 to vector<8x64xf32>
    %25 = arith.maximumf %23, %24 : vector<8x64xf32>
    %c0_23 = arith.constant 0 : index
    %c0_24 = arith.constant 0 : index
    %26 = vector.load %arg10[%c0_23, %c0_24] : memref<1x64xf32, #tpu.memory_space<vmem>>, vector<1x64xf32>
    %27 = vector.broadcast %26 : vector<1x64xf32> to vector<8x64xf32>
    %28 = arith.mulf %25, %27 : vector<8x64xf32>
    %cst_25 = arith.constant dense<0.000000e+00> : vector<8xf32>
    %29 = vector.multi_reduction <add>, %28, %cst_25 [1] : vector<8x64xf32> to vector<8xf32>
    %30 = vector.shape_cast %29 : vector<8xf32> to vector<8x1xf32>
    %c0_26 = arith.constant 0 : index
    %c0_27 = arith.constant 0 : index
    %31 = vector.load %arg11[%c0_26, %c0_27] : memref<1x1xf32, #tpu.memory_space<vmem>>, vector<1x1xf32>
    %32 = vector.broadcast %31 : vector<1x1xf32> to vector<8x1xf32>
    %33 = arith.addf %30, %32 : vector<8x1xf32>
    %cst_28 = arith.constant 0.000000e+00 : f32
    %34 = vector.broadcast %cst_28 : f32 to vector<8x1xf32>
    %35 = arith.maximumf %33, %34 : vector<8x1xf32>
    %c0_29 = arith.constant 0 : index
    %c0_30 = arith.constant 0 : index
    %36 = vector.load %arg12[%c0_29, %c0_30] : memref<8x1xf32, #tpu.memory_space<vmem>>, vector<8x1xf32>
    tpu.vector_store %arg12[%c0_29, %c0_30], %35 {strides = array<i32>} : memref<8x1xf32, #tpu.memory_space<vmem>>, vector<8x1xf32>,
    return
  }
  func.func @transform_0(%arg0: i32) -> (i32, i32) {
    %c0_i32 = arith.constant 0 : i32
    %c0_i32_0 = arith.constant 0 : i32
    return %arg0, %c0_i32 : i32, i32
  }
  func.func @transform_1(%arg0: i32) -> (i32, i32) {
    %c0_i32 = arith.constant 0 : i32
    %c0_i32_0 = arith.constant 0 : i32
    return %arg0, %c0_i32 : i32, i32
  }
  func.func @transform_2(%arg0: i32) -> (i32, i32) {
    %c0_i32 = arith.constant 0 : i32
    %c0_i32_0 = arith.constant 0 : i32
    %c0_i32_1 = arith.constant 0 : i32
    return %c0_i32, %c0_i32_0 : i32, i32
  }
  func.func @transform_3(%arg0: i32) -> (i32, i32) {
    %c0_i32 = arith.constant 0 : i32
    %c0_i32_0 = arith.constant 0 : i32
    %c0_i32_1 = arith.constant 0 : i32
    return %c0_i32, %c0_i32_0 : i32, i32
  }
  func.func @transform_4(%arg0: i32) -> (i32, i32) {
    %c0_i32 = arith.constant 0 : i32
    %c0_i32_0 = arith.constant 0 : i32
    %c0_i32_1 = arith.constant 0 : i32
    return %c0_i32, %c0_i32_0 : i32, i32
  }
  func.func @transform_5(%arg0: i32) -> (i32, i32) {
    %c0_i32 = arith.constant 0 : i32
    %c0_i32_0 = arith.constant 0 : i32
    %c0_i32_1 = arith.constant 0 : i32
    return %c0_i32, %c0_i32_0 : i32, i32
  }
  func.func @transform_6(%arg0: i32) -> (i32, i32) {
    %c0_i32 = arith.constant 0 : i32
    %c0_i32_0 = arith.constant 0 : i32
    %c0_i32_1 = arith.constant 0 : i32
    return %c0_i32, %c0_i32_0 : i32, i32
  }
  func.func @transform_7(%arg0: i32) -> (i32, i32) {
    %c0_i32 = arith.constant 0 : i32
    %c0_i32_0 = arith.constant 0 : i32
    %c0_i32_1 = arith.constant 0 : i32
    return %c0_i32, %c0_i32_0 : i32, i32
  }
  func.func @transform_8(%arg0: i32) -> (i32, i32) {
    %c0_i32 = arith.constant 0 : i32
    %c0_i32_0 = arith.constant 0 : i32
    %c0_i32_1 = arith.constant 0 : i32
    return %c0_i32, %c0_i32_0 : i32, i32
  }
  func.func @transform_9(%arg0: i32) -> (i32, i32) {
    %c0_i32 = arith.constant 0 : i32
    %c0_i32_0 = arith.constant 0 : i32
    %c0_i32_1 = arith.constant 0 : i32
    return %c0_i32, %c0_i32_0 : i32, i32
  }
  func.func @transform_10(%arg0: i32) -> (i32, i32) {
    %c0_i32 = arith.constant 0 : i32
    %c0_i32_0 = arith.constant 0 : i32
    %c0_i32_1 = arith.constant 0 : i32
    return %c0_i32, %c0_i32_0 : i32, i32
  }
  func.func @transform_11(%arg0: i32) -> (i32, i32) {
    %c0_i32 = arith.constant 0 : i32
    %c0_i32_0 = arith.constant 0 : i32
    return %arg0, %c0_i32 : i32, i32
  }
}

</mosaic_0001>

<bundles_post_ra>
// kernel: tpu_custom_call.1
= control target key start
LH: loop header
LB: loop body
LE: loop exit
PB: predicated region body
PF: predicated region fallthrough
CT: control target
= control target key end

     0   :  { %vm49_vm0 = vcmask 195584   ;;  %vm120_vm1 = vcmask 64512   ;;  %vm144_vm2 = vcmask 261120   ;;  %vm179_vm3 = vcmask 523264   ;;  %s359_s2 = inlined_call_operand.vmem [shape: f32[24,128], index: 2, kind: input, shape index: {}]   ;;  %s360_s4 = inlined_call_operand.vmem [shape: f32[128,32], index: 4, kind: input, shape index: {}]   ;;  %s361_s0 = inlined_call_operand.vmem [shape: f32[8,24], index: 0, kind: input, shape index: {}]   ;;  %s362_s3 = inlined_call_operand.vmem [shape: f32[1,128], index: 3, kind: input, shape index: {}]   ;;  %s363_s5 = inlined_call_operand.vmem [shape: f32[1,32], index: 5, kind: input, shape index: {}]   ;;  %s364_s6 = inlined_call_operand.vmem [shape: f32[32,64], index: 6, kind: input, shape index: {}]   ;;  %s365_s7 = inlined_call_operand.vmem [shape: f32[8,64], index: 7, kind: input, shape index: {}]   ;;  %s366_s1 = inlined_call_operand.vmem [shape: f32[8,8], index: 1, kind: input, shape index: {}]   ;;  %s367_s8 = inlined_call_operand.vmem [shape: f32[1,64], index: 8, kind: input, shape index: {}]   ;;  %s368_s9 = inlined_call_operand.vmem [shape: f32[1,64], index: 9, kind: input, shape index: {}]   ;;  %s369_s10 = inlined_call_operand.<no memory space> [shape: f32[1,1], index: 10, kind: input, shape index: {}]   ;;  %s370_s11 = inlined_call_operand.vmem [shape: f32[8,1], index: 11, kind: output, shape index: {}]  }
   0x1   :  { %v44_v0 = vld [vmem:[%s359_s2 + $0x10] sm:$0xff]  ;;  %v43_v1 = vld [vmem:[%s359_s2 + $0x8] sm:$0xff]  ;;  %v89_v2 = vld [vmem:[%s360_s4 + $0x78] sm:$0xff]  ;;  %v16_v34 = vstv %s369_s10  ;;  %vm189_vm4 = vcmask 7168  }
   0x2   :  { %66 = vmatpush.msra.mxu0 %v44_v0  ;;  %v88_v3 = vld [vmem:[%s360_s4 + $0x70] sm:$0xff]  ;;  %v42_v4 = vld [vmem:[%s359_s2] sm:$0xff]  ;;  %94 = vmatpush.msra.mxu1 %v89_v2  ;;  %v87_v6 = vld [vmem:[%s360_s4 + $0x68] sm:$0xff]  ;;  %17 = vst [vmem:[#allocation2] sm:$0x1] %v16_v34 }
   0x3   :  { %v40_v5 = vld [vmem:[%s361_s0] sm:$0xff]  ;;  %v85_v8 = vld [vmem:[%s360_s4 + $0x58] sm:$0xff]  ;;  %v84_v9 = vld [vmem:[%s360_s4 + $0x50] sm:$0xff] }
   0x4   :  { %67 = vmatpush.msra.mxu0 %v43_v1  ;;  %95 = vmatpush.msra.mxu1 %v88_v3  ;;  %v86_v7 = vld [vmem:[%s360_s4 + $0x60] sm:$0xff]  ;;  %v83_v10 = vld [vmem:[%s360_s4 + $0x48] sm:$0xff]  ;;  %v81_v12 = vld [vmem:[%s360_s4 + $0x38] sm:$0xff] }
   0x5   :  { %v82_v11 = vld [vmem:[%s360_s4 + $0x40] sm:$0xff]  ;;  %v80_v13 = vld [vmem:[%s360_s4 + $0x30] sm:$0xff]  ;;  %v79_v14 = vld [vmem:[%s360_s4 + $0x28] sm:$0xff] }
   0x6   :  { %68 = vmatpush.msra.mxu0 %v42_v4  ;;  %96 = vmatpush.msra.mxu1 %v87_v6  ;;  %v78_v15 = vld [vmem:[%s360_s4 + $0x20] sm:$0xff]  ;;  %v77_v16 = vld [vmem:[%s360_s4 + $0x18] sm:$0xff]  ;;  %v76_v17 = vld [vmem:[%s360_s4 + $0x10] sm:$0xff] }
   0x7   :  { %195 = vmatmul.msk.f32.vlgmr.msra.gmra.mxu0 %vm49_vm0, %v40_v5  ;;  %v75_v18 = vld [vmem:[%s360_s4 + $0x8] sm:$0xff]  ;;  %v74_v19 = vld [vmem:[%s360_s4] sm:$0xff]  ;;  %v118_v20 = vld [vmem:[%s364_s6 + $0x18] sm:$0xff] }
   0x8   :  { %97 = vmatpush.msra.mxu1 %v86_v7  ;;  %160 = vmatpush.msra.mxu3 %v118_v20  ;;  %v198_v21 = vld [vmem:[%s362_s3] ss:$0 sm:$0xff]  ;;  %v117_v25 = vld [vmem:[%s364_s6 + $0x10] sm:$0xff]  ;;  %v116_v26 = vld [vmem:[%s364_s6 + $0x8] sm:$0xff] }
   0x9   :  { %v119_v27 = vld [vmem:[%s365_s7] sm:$0xff] }
   0xa   :  { %98 = vmatpush.msra.mxu1 %v85_v8  ;;  %161 = vmatpush.msra.mxu3 %v117_v25  ;;  %v115_v28 = vld [vmem:[%s364_s6] sm:$0xff] }
   0xb   :  { %v41_v29 = vld [vmem:[%s366_s1] sm:$0xff]  ;;  %139 = vmatpush.msra.mxu2 %v119_v27 }
   0xc   :  { %99 = vmatpush.msra.mxu1 %v84_v9  ;;  %162 = vmatpush.msra.mxu3 %v116_v26  ;;  %v199_v30 = vld [vmem:[%s363_s5] ss:$0 sm:$0xff] }
   0xd   :  { %196 = vmatmul.msk.f32.vlgmr.msra.gmra.mxu2 %vm120_vm1, %v41_v29  ;;  %v200_v36 = vld [vmem:[%s367_s8] ss:$0 sm:$0xff] }
   0xe   :  { %100 = vmatpush.msra.mxu1 %v83_v10  ;;  %163 = vmatpush.msra.mxu3 %v115_v28  ;;  %v201_v40 = vld [vmem:[%s368_s9] ss:$0 sm:$0xff] }
   0xf   :  { %v202_v44 = vld [vmem:[#allocation2] ss:$0 sm:$0xff] }
  0x10   :  { %101 = vmatpush.msra.mxu1 %v82_v11 }
  0x12   :  { %102 = vmatpush.msra.mxu1 %v81_v12 }
  0x14   :  { %103 = vmatpush.msra.mxu1 %v80_v13 }
  0x16   :  { %104 = vmatpush.msra.mxu1 %v79_v14 }
  0x18   :  { %105 = vmatpush.msra.mxu1 %v78_v15 }
  0x1a   :  { %106 = vmatpush.msra.mxu1 %v77_v16 }
  0x1c   :  { %107 = vmatpush.msra.mxu1 %v76_v17 }
  0x1e   :  { %108 = vmatpush.msra.mxu1 %v75_v18 }
  0x20   :  { %109 = vmatpush.msra.mxu1 %v74_v19 }
  0x84   :  { %v70_v22 = vpop.f32.mrf.mxu0 }
  0x85   :  { %v71_v23 = vadd.f32 %v198_v21, %v70_v22 }
  0x87   :  { %v73_v24 = vmax.f32 %v71_v23, 0.0 }
  0x89   :  { %110 = vmatmul.f32.vlgmr.msra.gmra.mxu1 %v73_v24 }
  0x90   :  { %v141_v35 = vpop.f32.mrf.mxu2 }
 0x106   :  { %v111_v31 = vpop.f32.mrf.mxu1 }
 0x107   :  { %v112_v32 = vadd.f32 %v199_v30, %v111_v31 }
 0x109   :  { %v114_v33 = vmax.f32 %v112_v32, 0.0 }
 0x10b   :  { %197 = vmatmul.msk.f32.vlgmr.msra.gmra.mxu3 %vm144_vm2, %v114_v33 }
 0x18e   :  { %v165_v37 = vpop.f32.mrf.mxu3 }
 0x18f   :  { %v166_v38 = vadd.f32 %v165_v37, %v141_v35 }
 0x191   :  { %v172_v39 = vadd.f32 %v200_v36, %v166_v38 }
 0x193   :  { %v173_v41 = vmax.f32 %v172_v39, 0.0 }
 0x195   :  { %v178_v42 = vmul.f32 %v201_v40, %v173_v41 }
 0x197   :  { %v180_v43 = vsel %vm179_vm3, %v178_v42, 0.0 }
 0x198   :  { %181 = vadd.xlane.f32.xlu0 %v180_v43 }
 0x20b   :  { %v182_v45 = vpop.xlane.xlu0 %181 }
 0x20c   :  { %v187_v46 = vadd.f32 %v202_v44, %v182_v45 }
 0x20e   :  { %v188_v47 = vmax.f32 %v187_v46, 0.0 }
 0x210   :  { %190 = vst.msk [vmem:[%s370_s11] sm:$0xff] %vm189_vm4, %v188_v47 }

</bundles_post_ra>
